<compile_context>
chip_gen: v7x
topology: tpu7x:2x2x1
jax: 0.10.0
libtpu: 0.0.40
codegen_flags: <defaults>
</compile_context>

<pallas_src>
import jax
import jax.numpy as jnp
from jax.experimental import pallas as pl
from jax.experimental.pallas import tpu as pltpu


def _round_up(x, m):
    return ((x + m - 1) // m) * m


def _pick_batch_tile(B, F, D, dtype_bytes, target_block_bytes=2 << 20):
    """Pick a batch tile giving ~2 MiB input blocks, >=2 grid steps when possible."""
    if B <= 128:
        # Small batch: one (padded) block, grid == 1.
        return _round_up(B, 8)
    row_bytes = max(1, F * D * dtype_bytes)
    tb = max(128, (target_block_bytes // row_bytes) // 128 * 128)
    # Keep at least 2 grid steps (DMA/compute overlap + v7x megacore sharding).
    half = max(128, (_round_up(B, 2) // 2) // 128 * 128)
    return min(tb, half)


def _fm_kernel_reduce(x_ref, o_ref):
    # x_ref: (tb, F, D), o_ref: (1, tb)  -- lane-dense scalar per batch row.
    x = x_ref[...]
    if x.dtype != jnp.float32:
        x = x.astype(jnp.float32)  # f32 accumulation (v5e VPU has no bf16 path)
    s = jnp.sum(x, axis=1)                                        # (tb, D)
    square_of_sum = jnp.sum(s * s, axis=-1, keepdims=True)        # (tb, 1)
    sum_of_square = jnp.sum(jnp.sum(x * x, axis=1), axis=-1,
                            keepdims=True)                        # (tb, 1)
    out = 0.5 * (square_of_sum - sum_of_square)                   # (tb, 1)
    # Relayout to lane-major so the store is an unmasked full-lane vst.
    o_ref[...] = out.reshape(1, -1).astype(o_ref.dtype)


def _fm_kernel_no_reduce(x_ref, o_ref):
    # x_ref: (tb, F, D), o_ref: (tb, D)
    x = x_ref[...]
    if x.dtype != jnp.float32:
        x = x.astype(jnp.float32)
    s = jnp.sum(x, axis=1)                                        # (tb, D)
    sum_of_square = jnp.sum(x * x, axis=1)                        # (tb, D)
    o_ref[...] = (0.5 * (s * s - sum_of_square)).astype(o_ref.dtype)


# TODO(synk): when embed_dim < 128 only D/128 of each vreg's lanes are used;
# a producer-provided batch-on-lanes layout (e.g. (F, D, B)) would fix lane
# utilization, but a wrapper-side transpose would double HBM traffic, so it is
# intentionally not done here.
def factorization_machine(x, reduce_sum=True, *, batch_tile=None):
    """x: (batch, num_fields, embed_dim) float array."""
    B, F, D = x.shape
    itemsize = jnp.dtype(x.dtype).itemsize

    if batch_tile is None:
        tb = _pick_batch_tile(B, F, D, itemsize)
    else:
        tb = _round_up(min(int(batch_tile), _round_up(B, 8)), 8)
        if tb < B:
            # grid > 1: keep the lane-dense reduce output block (1, tb) legal.
            tb = _round_up(tb, 128)

    B_pad = _round_up(B, tb)
    if B_pad != B:
        # Zero rows contribute exactly 0 to the FM interaction.
        x = jnp.pad(x, ((0, B_pad - B), (0, 0), (0, 0)))
    grid = (B_pad // tb,)

    block_bytes = tb * F * D * itemsize
    # Double-buffered input + intermediates; explicit so v5e (16 MiB default
    # scoped VMEM) keeps pipelining and v7x (64 MiB total) never over-asks.
    vmem_limit = int(min(56 << 20, max(16 << 20, 4 * block_bytes + (4 << 20))))

    in_spec = pl.BlockSpec((tb, F, D), lambda i: (i, 0, 0))

    if reduce_sum:
        out_shape = jax.ShapeDtypeStruct((1, B_pad), x.dtype)
        out_spec = pl.BlockSpec((1, tb), lambda i: (0, i))
        kernel = _fm_kernel_reduce
        out_bytes = B_pad * itemsize
    else:
        out_shape = jax.ShapeDtypeStruct((B_pad, D), x.dtype)
        out_spec = pl.BlockSpec((tb, D), lambda i: (i, 0))
        kernel = _fm_kernel_no_reduce
        out_bytes = B_pad * D * itemsize

    cost = pl.CostEstimate(
        flops=4 * B_pad * F * D,
        transcendentals=0,
        bytes_accessed=B_pad * F * D * itemsize + out_bytes,
    )

    out = pl.pallas_call(
        kernel,
        out_shape=out_shape,
        grid_spec=pltpu.PrefetchScalarGridSpec(
            num_scalar_prefetch=0,
            grid=grid,
            in_specs=[in_spec],
            out_specs=out_spec,
        ),
        compiler_params=pltpu.CompilerParams(
            dimension_semantics=("parallel",),
            vmem_limit_bytes=vmem_limit,
        ),
        cost_estimate=cost,
    )(x)

    if reduce_sum:
        return out[0, :B].reshape(B, 1)
    return out[:B]


def _fm_reference(x, reduce_sum=True):
    square_of_sum = jnp.sum(x, axis=1) ** 2
    sum_of_square = jnp.sum(x ** 2, axis=1)
    ix = square_of_sum - sum_of_square
    if reduce_sum:
        ix = jnp.sum(ix, axis=1, keepdims=True)
    return 0.5 * ix


if __name__ == "__main__":
    key = jax.random.PRNGKey(0)
    batch, num_fields, embed_dim = 16, 8, 32
    x = jax.random.normal(key, (batch, num_fields, embed_dim), dtype=jnp.float32)

    # reduce_sum=True (module default); small batch -> single block path.
    out = jax.block_until_ready(factorization_machine(x, reduce_sum=True))
    ref = _fm_reference(x, reduce_sum=True)
    assert out.shape == (batch, 1), out.shape
    assert jnp.allclose(out, ref, atol=1e-4, rtol=1e-4), "mismatch (reduce_sum=True)"

    # reduce_sum=False variant.
    out2 = jax.block_until_ready(factorization_machine(x, reduce_sum=False))
    ref2 = _fm_reference(x, reduce_sum=False)
    assert out2.shape == (batch, embed_dim), out2.shape
    assert jnp.allclose(out2, ref2, atol=1e-4, rtol=1e-4), "mismatch (reduce_sum=False)"

    # Ragged, larger batch: exercises multi-tile grid (grid > 1), zero padding,
    # and the lane-dense (1, tb) reduce output path.
    xb = jax.random.normal(jax.random.PRNGKey(1), (300, num_fields, embed_dim),
                           dtype=jnp.float32)
    out3 = jax.block_until_ready(factorization_machine(xb, reduce_sum=True))
    ref3 = _fm_reference(xb, reduce_sum=True)
    assert out3.shape == (300, 1), out3.shape
    assert jnp.allclose(out3, ref3, atol=1e-4, rtol=1e-4), "mismatch (large batch)"

    print("KERNEL_OK")
</pallas_src>

<mosaic_0001>
module attributes {stable_mosaic.version = 11 : i64} {
  func.func @_fm_kernel_reduce(%arg0: i32, %arg1: memref<16x8x32xf32, #tpu.memory_space<vmem>>, %arg2: memref<1x16xf32, #tpu.memory_space<vmem>>) attributes {dimension_semantics = [#tpu.dimension_semantics<parallel>], iteration_bounds = array<i64: 1>, scalar_prefetch = 0 : i64, scratch_operands = 0 : i64, tpu.core_type = #tpu.core_type<tc>, window_params = [{transform_indices = @transform_0, window_bounds = array<i64: 16, 8, 32>}, {transform_indices = @transform_1, window_bounds = array<i64: 1, 16>}]} {
    %c0 = arith.constant 0 : index
    %c0_0 = arith.constant 0 : index
    %c0_1 = arith.constant 0 : index
    %0 = vector.load %arg1[%c0, %c0_0, %c0_1] : memref<16x8x32xf32, #tpu.memory_space<vmem>>, vector<16x8x32xf32>
    %cst = arith.constant dense<0.000000e+00> : vector<16x32xf32>
    %1 = vector.multi_reduction <add>, %0, %cst [1] : vector<16x8x32xf32> to vector<16x32xf32>
    %2 = arith.mulf %1, %1 : vector<16x32xf32>
    %cst_2 = arith.constant dense<0.000000e+00> : vector<16xf32>
    %3 = vector.multi_reduction <add>, %2, %cst_2 [1] : vector<16x32xf32> to vector<16xf32>
    %4 = vector.shape_cast %3 : vector<16xf32> to vector<16x1xf32>
    %5 = arith.mulf %0, %0 : vector<16x8x32xf32>
    %cst_3 = arith.constant dense<0.000000e+00> : vector<16x32xf32>
    %6 = vector.multi_reduction <add>, %5, %cst_3 [1] : vector<16x8x32xf32> to vector<16x32xf32>
    %cst_4 = arith.constant dense<0.000000e+00> : vector<16xf32>
    %7 = vector.multi_reduction <add>, %6, %cst_4 [1] : vector<16x32xf32> to vector<16xf32>
    %8 = vector.shape_cast %7 : vector<16xf32> to vector<16x1xf32>
    %9 = arith.subf %4, %8 : vector<16x1xf32>
    %cst_5 = arith.constant 5.000000e-01 : f32
    %10 = vector.broadcast %cst_5 : f32 to vector<16x1xf32>
    %11 = arith.mulf %10, %9 : vector<16x1xf32>
    %12 = vector.shape_cast %11 : vector<16x1xf32> to vector<1x16xf32>
    %c0_6 = arith.constant 0 : index
    %c0_7 = arith.constant 0 : index
    %13 = vector.load %arg2[%c0_6, %c0_7] : memref<1x16xf32, #tpu.memory_space<vmem>>, vector<1x16xf32>
    tpu.vector_store %arg2[%c0_6, %c0_7], %12 {strides = array<i32>} : memref<1x16xf32, #tpu.memory_space<vmem>>, vector<1x16xf32>,
    return
  }
  func.func @transform_0(%arg0: i32) -> (i32, i32, i32) {
    %c0_i32 = arith.constant 0 : i32
    %c0_i32_0 = arith.constant 0 : i32
    %c0_i32_1 = arith.constant 0 : i32
    return %arg0, %c0_i32, %c0_i32_0 : i32, i32, i32
  }
  func.func @transform_1(%arg0: i32) -> (i32, i32) {
    %c0_i32 = arith.constant 0 : i32
    %c0_i32_0 = arith.constant 0 : i32
    return %c0_i32, %arg0 : i32, i32
  }
}

</mosaic_0001>

<bundles_post_ra>
// kernel: tpu_custom_call.1
= control target key start
LH: loop header
LB: loop body
LE: loop exit
PB: predicated region body
PF: predicated region fallthrough
CT: control target
= control target key end

     0   :  { %6 = vsyncpa [#allocation3], 0  ;;  %s651_s0 = inlined_call_operand.hbm [shape: f32[16,8,32], index: 0, kind: input, shape index: {}]   ;;  %s652_s1 = inlined_call_operand.hbm [shape: f32[1,16], index: 1, kind: output, shape index: {}]  }
   0x1   :  { %7 = vsyncpa [#allocation4], 0  ;;  %s468_s6 = smov [#allocation2]   ;;  %s420_s10 = scalar_lea.hbm %s651_s0, 2048 }
   0x2   :  { %s13_s7 = sshll.u32 %s468_s6, 4  ;;  %p421_p0 = scmp.ne.s32.totalorder %s651_s0, %s420_s10  ;;  %s14_s7 = int_to_ptr.vmem [resolvable:$true] %s13_s7 }
   0x3   :  { %p424_p1 = scmp.lt.u32.totalorder %s420_s10, %s651_s0 }
   0x5   :  { %p426_p2 = pnand %p424_p1, %p421_p0 }
   0x7   :  { %429 = shalt.err (!%p426_p2)
}
   0x8   :  { %s430_s15 = scalar_lea.vmem %s14_s7, 2048  ;;  %p435_p4 = scmp.lt.s32.totalorder %s14_s7, %s14_s7 }
   0x9   :  { %p431_p3 = scmp.ne.s32.totalorder %s14_s7, %s430_s15  ;;  %p436_p5 = scmp.lt.s32.totalorder %s430_s15, %s430_s15 }
   0xb   :  { %p437_p6 = por %p436_p5, %p435_p4 }
   0xd   :  { %p438_p7 = pnand %p437_p6, %p431_p3 }
   0xf   :  { %441 = shalt.err (!%p438_p7)
}
  0x10   :  { %s469_s16 = smov 128   ;;  %s470_s17 = smov 8  }
  0x11   :  { %19 = dma.hbm_to_vmem [thread:$0]  %s651_s0, 2048, %s14_s7, [#allocation3], %s469_s16, %s469_s16, %s470_s17  }
  0x12   :  { %464 = dma.done.wait [#allocation3], 2048  }
  0x13   :  { %465 = vsyncadd [#allocation3], 4294965248  ;;  %vm39_vm0 = vcmask 261120   ;;  %v23_v0 = vld [vmem:[#allocation2] sm:$0xff]  ;;  %v494_v1 = vld [vmem:[#allocation2 + $0x8] sm:$0xff]  ;;  %vm184_vm1 = vcmask 1041409  }
  0x14   :  { %v496_v2 = vld [vmem:[#allocation2 + $0x10] sm:$0xff]  ;;  %v498_v3 = vld [vmem:[#allocation2 + $0x18] sm:$0xff]  ;;  %v500_v4 = vld [vmem:[#allocation2 + $0x20] sm:$0xff]  ;;  %v213_v6 = vmul.f32 %v23_v0, %v23_v0  ;;  %v214_v7 = vmul.f32 %v494_v1, %v494_v1  ;;  %v509_v9 = vsel %vm39_vm0, %v23_v0, 0.0  ;;  %vm186_vm2 = vcmask 1042434   ;;  %s471_s0 = smov [#allocation5]  }
  0x15   :  { %v502_v5 = vld [vmem:[#allocation2 + $0x28] sm:$0xff]  ;;  %v215_v8 = vmul.f32 %v496_v2, %v496_v2  ;;  %v511_v10 = vld [vmem:[#allocation2 + $0x30] sm:$0xff]  ;;  %v513_v11 = vld [vmem:[#allocation2 + $0x38] sm:$0xff]  ;;  %v216_v12 = vmul.f32 %v498_v3, %v498_v3  ;;  %v217_v13 = vmul.f32 %v500_v4, %v500_v4  ;;  %v41_v15 = vrot.slane %v509_v9, 4  ;;  %s407_s20 = sshll.u32 %s471_s0, 4  ;;  %s408_s20 = int_to_ptr.vmem [resolvable:$true] %s407_s20 }
  0x16   :  { %v218_v14 = vmul.f32 %v502_v5, %v502_v5  ;;  %v219_v16 = vmul.f32 %v511_v10, %v511_v10  ;;  %v220_v17 = vmul.f32 %v513_v11, %v513_v11  ;;  %v229_v18 = vsel %vm39_vm0, %v213_v6, 0.0  ;;  %s442_s21 = scalar_lea.vmem %s408_s20, 16  ;;  %s446_s22 = scalar_lea.vmem %s408_s20, 32 }
  0x17   :  { %v236_v19 = vsel %vm39_vm0, %v214_v7, 0.0  ;;  %v230_v20 = vrot.slane %v229_v18, 4  ;;  %v243_v22 = vsel %vm39_vm0, %v215_v8, 0.0  ;;  %v250_v23 = vsel %vm39_vm0, %v216_v12, 0.0  ;;  %p443_p8 = scmp.ne.s32.totalorder %s408_s20, %s442_s21  ;;  %p447_p9 = scmp.lt.s32.totalorder %s408_s20, %s408_s20 }
  0x18   :  { %v237_v21 = vrot.slane %v236_v19, 4  ;;  %v244_v24 = vrot.slane %v243_v22, 4  ;;  %v251_v25 = vrot.slane %v250_v23, 4  ;;  %v257_v26 = vsel %vm39_vm0, %v217_v13, 0.0  ;;  %p448_p10 = scmp.lt.s32.totalorder %s446_s22, %s442_s21 }
  0x19   :  { %v264_v27 = vsel %vm39_vm0, %v218_v14, 0.0  ;;  %v231_v28 = vadd.f32 %v230_v20, %v229_v18  ;;  %v258_v30 = vrot.slane %v257_v26, 4  ;;  %vm188_vm3 = vcmask 1043459  }
  0x1a   :  { %v238_v29 = vadd.f32 %v237_v21, %v236_v19  ;;  %v265_v31 = vrot.slane %v264_v27, 4  ;;  %v245_v32 = vadd.f32 %v244_v24, %v243_v22  ;;  %v252_v33 = vadd.f32 %v251_v25, %v250_v23  ;;  %p449_p11 = por %p448_p10, %p447_p9 }
  0x1b   :  { %v271_v34 = vsel %vm39_vm0, %v219_v16, 0.0  ;;  %v278_v35 = vsel %vm39_vm0, %v220_v17, 0.0  ;;  %vm190_vm4 = vcmask 1044484   ;;  %v232_v36 = vrot.slane %v231_v28, 2 }
  0x1c   :  { %v239_v37 = vrot.slane %v238_v29, 2  ;;  %v259_v38 = vadd.f32 %v258_v30, %v257_v26  ;;  %v266_v39 = vadd.f32 %v265_v31, %v264_v27  ;;  %vm192_vm5 = vcmask 1045509   ;;  %p450_p12 = pnand %p449_p11, %p443_p8 }
  0x1d   :  { %v246_v40 = vrot.slane %v245_v32, 2  ;;  %v253_v41 = vrot.slane %v252_v33, 2  ;;  %v272_v42 = vrot.slane %v271_v34, 4  ;;  %v279_v43 = vrot.slane %v278_v35, 4 }
  0x1e   :  { %vm194_vm6 = vcmask 1046534   ;;  %v233_v44 = vadd.f32 %v232_v36, %v231_v28  ;;  %v240_v45 = vadd.f32 %v239_v37, %v238_v29  ;;  %v260_v46 = vrot.slane %v259_v38, 2 }
  0x1f   :  { %v267_v47 = vrot.slane %v266_v39, 2  ;;  %vm196_vm7 = vcmask 1047559   ;;  %v247_v48 = vadd.f32 %v246_v40, %v245_v32  ;;  %v254_v49 = vadd.f32 %v253_v41, %v252_v33 }
  0x20   :  { %v273_v50 = vadd.f32 %v272_v42, %v271_v34  ;;  %v280_v51 = vadd.f32 %v279_v43, %v278_v35  ;;  %v234_v52 = vrot.slane %v233_v44, 1  ;;  %v241_v53 = vrot.slane %v240_v45, 1 }
  0x21   :  { %v261_v54 = vadd.f32 %v260_v46, %v259_v38  ;;  %v268_v55 = vadd.f32 %v267_v47, %v266_v39  ;;  %v248_v56 = vrot.slane %v247_v48, 1  ;;  %v255_v57 = vrot.slane %v254_v49, 1 }
  0x22   :  { %v274_v58 = vrot.slane %v273_v50, 2  ;;  %v281_v59 = vrot.slane %v280_v51, 2  ;;  %v235_v60 = vadd.f32 %v234_v52, %v233_v44  ;;  %v242_v61 = vadd.f32 %v241_v53, %v240_v45 }
  0x23   :  { %v262_v62 = vrot.slane %v261_v54, 1  ;;  %v269_v63 = vrot.slane %v268_v55, 1  ;;  %v249_v0 = vadd.f32 %v248_v56, %v247_v48  ;;  %v256_v6 = vadd.f32 %v255_v57, %v254_v49 }
  0x24   :  { %v275_v7 = vadd.f32 %v274_v58, %v273_v50  ;;  %v282_v8 = vadd.f32 %v281_v59, %v280_v51  ;;  %v357_v14 = vsel %vm184_vm1, %v242_v61, %v235_v60  ;;  %v42_v16 = vadd.f32 %v41_v15, %v509_v9  ;;  %v559_v51 = vld [vmem:[#allocation2 + $0x40] sm:$0xff]  ;;  %v561_v59 = vld [vmem:[#allocation2 + $0x48] sm:$0xff] }
  0x25   :  { %v263_v12 = vadd.f32 %v262_v62, %v261_v54  ;;  %v270_v13 = vadd.f32 %v269_v63, %v268_v55  ;;  %v358_v19 = vsel %vm186_vm2, %v249_v0, %v357_v14  ;;  %v47_v20 = vsel %vm39_vm0, %v494_v1, 0.0  ;;  %v567_v14 = vld [vmem:[#allocation2 + $0x58] sm:$0xff] }
  0x26   :  { %v276_v17 = vrot.slane %v275_v7, 1  ;;  %v283_v18 = vrot.slane %v282_v8, 1  ;;  %v359_v21 = vsel %vm188_vm3, %v256_v6, %v358_v19  ;;  %v43_v22 = vrot.slane %v42_v16, 2 }
  0x27   :  { %v48_v23 = vrot.slane %v47_v20, 4  ;;  %v54_v24 = vsel %vm39_vm0, %v496_v2, 0.0  ;;  %v360_v27 = vsel %vm190_vm4, %v263_v12, %v359_v21  ;;  %v61_v30 = vsel %vm39_vm0, %v498_v3, 0.0  ;;  %v572_v21 = vld [vmem:[#allocation2 + $0x60] sm:$0xff] }
  0x28   :  { %v277_v25 = vadd.f32 %v276_v17, %v275_v7  ;;  %v284_v26 = vadd.f32 %v283_v18, %v282_v8  ;;  %v55_v28 = vrot.slane %v54_v24, 4  ;;  %v361_v9 = vsel %vm192_vm5, %v270_v13, %v360_v27  ;;  %v565_v7 = vld [vmem:[#allocation2 + $0x50] sm:$0xff] }
  0x29   :  { %v44_v15 = vadd.f32 %v43_v22, %v42_v16  ;;  %v49_v29 = vadd.f32 %v48_v23, %v47_v20  ;;  %v62_v32 = vrot.slane %v61_v30, 4  ;;  %v68_v33 = vsel %vm39_vm0, %v500_v4, 0.0  ;;  %v574_v22 = vld [vmem:[#allocation2 + $0x68] sm:$0xff] }
  0x2a   :  { %v362_v1 = vsel %vm194_vm6, %v277_v25, %v361_v9  ;;  %v56_v31 = vadd.f32 %v55_v28, %v54_v24  ;;  %v69_v36 = vrot.slane %v68_v33, 4  ;;  %v75_v40 = vsel %vm39_vm0, %v502_v5, 0.0 }
  0x2b   :  { %v363_v2 = vsel %vm196_vm7, %v284_v26, %v362_v1  ;;  %v45_v34 = vrot.slane %v44_v15, 1  ;;  %v50_v35 = vrot.slane %v49_v29, 2  ;;  %v63_v39 = vadd.f32 %v62_v32, %v61_v30  ;;  %v577_v26 = vld [vmem:[#allocation2 + $0x70] sm:$0xff] }
  0x2c   :  { %v373_v37 = vsel %vm39_vm0, %v363_v2, 0.0  ;;  %v57_v38 = vrot.slane %v56_v31, 2  ;;  %v70_v42 = vadd.f32 %v69_v36, %v68_v33  ;;  %v76_v43 = vrot.slane %v75_v40, 4 }
  0x2d   :  { %374 = vadd.xlane.f32.xlu1 %v373_v37  ;;  %v46_v3 = vadd.f32 %v45_v34, %v44_v15  ;;  %v51_v41 = vadd.f32 %v50_v35, %v49_v29  ;;  %v64_v45 = vrot.slane %v63_v39, 2  ;;  %v82_v4 = vsel %vm39_vm0, %v511_v10, 0.0  ;;  %v581_v29 = vld [vmem:[#allocation2 + $0x78] sm:$0xff] }
  0x2e   :  { %v58_v44 = vadd.f32 %v57_v38, %v56_v31  ;;  %v89_v46 = vsel %vm39_vm0, %v513_v11, 0.0  ;;  %v71_v48 = vrot.slane %v70_v42, 2  ;;  %v77_v49 = vadd.f32 %v76_v43, %v75_v40 }
  0x2f   :  { %v52_v47 = vrot.slane %v51_v41, 1  ;;  %v83_v50 = vrot.slane %v82_v4, 4  ;;  %v65_v52 = vadd.f32 %v64_v45, %v63_v39  ;;  %v90_v53 = vrot.slane %v89_v46, 4 }
  0x30   :  { %v59_v5 = vrot.slane %v58_v44, 1  ;;  %v152_v54 = vmul.f32 %v46_v3, %v46_v3  ;;  %v72_v56 = vadd.f32 %v71_v48, %v70_v42  ;;  %v78_v57 = vrot.slane %v77_v49, 2 }
  0x31   :  { %v53_v55 = vadd.f32 %v52_v47, %v51_v41  ;;  %v84_v58 = vadd.f32 %v83_v50, %v82_v4  ;;  %v66_v60 = vrot.slane %v65_v52, 1  ;;  %v91_v61 = vadd.f32 %v90_v53, %v89_v46 }
  0x32   :  { %v60_v10 = vadd.f32 %v59_v5, %v58_v44  ;;  %v221_v11 = vmul.f32 %v559_v51, %v559_v51  ;;  %v73_v62 = vrot.slane %v72_v56, 1  ;;  %v79_v63 = vadd.f32 %v78_v57, %v77_v49 }
  0x33   :  { %v85_v0 = vrot.slane %v84_v58, 2  ;;  %v153_v6 = vmul.f32 %v53_v55, %v53_v55  ;;  %v67_v8 = vadd.f32 %v66_v60, %v65_v52  ;;  %v92_v12 = vrot.slane %v91_v61, 2 }
  0x34   :  { %v154_v13 = vmul.f32 %v60_v10, %v60_v10  ;;  %v222_v16 = vmul.f32 %v561_v59, %v561_v59  ;;  %v74_v17 = vadd.f32 %v73_v62, %v72_v56  ;;  %v80_v18 = vrot.slane %v79_v63, 1 }
  0x35   :  { %v86_v19 = vadd.f32 %v85_v0, %v84_v58  ;;  %v185_v20 = vsel %vm184_vm1, %v153_v6, %v152_v54  ;;  %v93_v23 = vadd.f32 %v92_v12, %v91_v61  ;;  %v155_v24 = vmul.f32 %v67_v8, %v67_v8 }
  0x36   :  { %v187_v25 = vsel %vm186_vm2, %v154_v13, %v185_v20  ;;  %v223_v27 = vmul.f32 %v565_v7, %v565_v7  ;;  %v81_v28 = vadd.f32 %v80_v18, %v79_v63  ;;  %v156_v15 = vmul.f32 %v74_v17, %v74_v17 }
  0x37   :  { %v87_v9 = vrot.slane %v86_v19, 1  ;;  %v224_v30 = vmul.f32 %v567_v14, %v567_v14  ;;  %v94_v1 = vrot.slane %v93_v23, 1  ;;  %v189_v31 = vsel %vm188_vm3, %v155_v24, %v187_v25 }
  0x38   :  { %v225_v32 = vmul.f32 %v572_v21, %v572_v21  ;;  %v226_v33 = vmul.f32 %v574_v22, %v574_v22  ;;  %v157_v34 = vmul.f32 %v81_v28, %v81_v28  ;;  %v191_v35 = vsel %vm190_vm4, %v156_v15, %v189_v31 }
  0x39   :  { %v88_v2 = vadd.f32 %v87_v9, %v86_v19  ;;  %v227_v36 = vmul.f32 %v577_v26, %v577_v26  ;;  %v95_v37 = vadd.f32 %v94_v1, %v93_v23  ;;  %v228_v38 = vmul.f32 %v581_v29, %v581_v29 }
  0x3a   :  { %v285_v39 = vsel %vm39_vm0, %v221_v11, 0.0  ;;  %v292_v40 = vsel %vm39_vm0, %v222_v16, 0.0  ;;  %v193_v41 = vsel %vm192_vm5, %v157_v34, %v191_v35  ;;  %v299_v45 = vsel %vm39_vm0, %v223_v27, 0.0 }
  0x3b   :  { %v158_v3 = vmul.f32 %v88_v2, %v88_v2  ;;  %v286_v42 = vrot.slane %v285_v39, 4  ;;  %v293_v43 = vrot.slane %v292_v40, 4  ;;  %v159_v44 = vmul.f32 %v95_v37, %v95_v37 }
  0x3c   :  { %v306_v4 = vsel %vm39_vm0, %v224_v30, 0.0  ;;  %v313_v46 = vsel %vm39_vm0, %v225_v32, 0.0  ;;  %v300_v50 = vrot.slane %v299_v45, 4  ;;  %v320_v54 = vsel %vm39_vm0, %v226_v33, 0.0 }
  0x3d   :  { %v195_v47 = vsel %vm194_vm6, %v158_v3, %v193_v41  ;;  %v287_v48 = vadd.f32 %v286_v42, %v285_v39  ;;  %v294_v49 = vadd.f32 %v293_v43, %v292_v40  ;;  %v307_v52 = vrot.slane %v306_v4, 4 }
  0x3e   :  { %v197_v5 = vsel %vm196_vm7, %v159_v44, %v195_v47  ;;  %v314_v53 = vrot.slane %v313_v46, 4  ;;  %v301_v58 = vadd.f32 %v300_v50, %v299_v45  ;;  %v321_v61 = vrot.slane %v320_v54, 4 }
  0x3f   :  { %v207_v55 = vsel %vm39_vm0, %v197_v5, 0.0  ;;  %v288_v56 = vrot.slane %v287_v48, 2  ;;  %v295_v57 = vrot.slane %v294_v49, 2  ;;  %v308_v10 = vadd.f32 %v307_v52, %v306_v4 }
  0x40   :  { %208 = vadd.xlane.f32.xlu0 %v207_v55  ;;  %v315_v60 = vadd.f32 %v314_v53, %v313_v46  ;;  %v327_v11 = vsel %vm39_vm0, %v227_v36, 0.0  ;;  %v302_v0 = vrot.slane %v301_v58, 2  ;;  %v322_v13 = vadd.f32 %v321_v61, %v320_v54 }
  0x41   :  { %v289_v62 = vadd.f32 %v288_v56, %v287_v48  ;;  %v296_v63 = vadd.f32 %v295_v57, %v294_v49  ;;  %v328_v6 = vrot.slane %v327_v11, 4  ;;  %v309_v8 = vrot.slane %v308_v10, 2 }
  0x42   :  { %v316_v12 = vrot.slane %v315_v60, 2  ;;  %v334_v16 = vsel %vm39_vm0, %v228_v38, 0.0  ;;  %v303_v19 = vadd.f32 %v302_v0, %v301_v58  ;;  %v323_v25 = vrot.slane %v322_v13, 2 }
  0x43   :  { %v290_v17 = vrot.slane %v289_v62, 1  ;;  %v297_v18 = vrot.slane %v296_v63, 1  ;;  %v329_v20 = vadd.f32 %v328_v6, %v327_v11  ;;  %v310_v23 = vadd.f32 %v309_v8, %v308_v10 }
  0x44   :  { %v317_v24 = vadd.f32 %v316_v12, %v315_v60  ;;  %v335_v27 = vrot.slane %v334_v16, 4  ;;  %v304_v15 = vrot.slane %v303_v19, 1  ;;  %v324_v32 = vadd.f32 %v323_v25, %v322_v13 }
  0x45   :  { %v291_v28 = vadd.f32 %v290_v17, %v289_v62  ;;  %v298_v9 = vadd.f32 %v297_v18, %v296_v63  ;;  %v330_v30 = vrot.slane %v329_v20, 2  ;;  %v311_v1 = vrot.slane %v310_v23, 1 }
  0x46   :  { %v318_v31 = vrot.slane %v317_v24, 1  ;;  %v336_v33 = vadd.f32 %v335_v27, %v334_v16  ;;  %v305_v2 = vadd.f32 %v304_v15, %v303_v19  ;;  %v96_v36 = vsel %vm39_vm0, %v559_v51, 0.0 }
  0x47   :  { %v331_v34 = vadd.f32 %v330_v30, %v329_v20  ;;  %v364_v35 = vsel %vm184_vm1, %v298_v9, %v291_v28  ;;  %v312_v37 = vadd.f32 %v311_v1, %v310_v23  ;;  %v325_v39 = vrot.slane %v324_v32, 1 }
  0x48   :  { %v319_v38 = vadd.f32 %v318_v31, %v317_v24  ;;  %v337_v40 = vrot.slane %v336_v33, 2  ;;  %v365_v41 = vsel %vm186_vm2, %v305_v2, %v364_v35  ;;  %v97_v42 = vrot.slane %v96_v36, 4 }
  0x49   :  { %v332_v3 = vrot.slane %v331_v34, 1  ;;  %v103_v43 = vsel %vm39_vm0, %v561_v59, 0.0  ;;  %v326_v44 = vadd.f32 %v325_v39, %v324_v32  ;;  %v366_v4 = vsel %vm188_vm3, %v312_v37, %v365_v41 }
  0x4a   :  { %v338_v45 = vadd.f32 %v337_v40, %v336_v33  ;;  %v104_v46 = vrot.slane %v103_v43, 4  ;;  %v367_v48 = vsel %vm190_vm4, %v319_v38, %v366_v4  ;;  %v98_v51 = vadd.f32 %v97_v42, %v96_v36 }
  0x4b   :  { %v333_v47 = vadd.f32 %v332_v3, %v331_v34  ;;  %v110_v49 = vsel %vm39_vm0, %v565_v7, 0.0  ;;  %v368_v5 = vsel %vm192_vm5, %v326_v44, %v367_v48  ;;  %v117_v55 = vsel %vm39_vm0, %v567_v14, 0.0 }
  0x4c   :  { %v339_v50 = vrot.slane %v338_v45, 1  ;;  %v105_v52 = vadd.f32 %v104_v46, %v103_v43  ;;  %v111_v53 = vrot.slane %v110_v49, 4  ;;  %v99_v59 = vrot.slane %v98_v51, 2 }
  0x4d   :  { %v369_v54 = vsel %vm194_vm6, %v333_v47, %v368_v5  ;;  %v124_v56 = vsel %vm39_vm0, %v572_v21, 0.0  ;;  %v118_v60 = vrot.slane %v117_v55, 4  ;;  %v131_v11 = vsel %vm39_vm0, %v574_v22, 0.0 }
  0x4e   :  { %v340_v57 = vadd.f32 %v339_v50, %v338_v45  ;;  %v106_v58 = vrot.slane %v105_v52, 2  ;;  %v112_v10 = vadd.f32 %v111_v53, %v110_v49  ;;  %v100_v61 = vadd.f32 %v99_v59, %v98_v51 }
  0x4f   :  { %v125_v7 = vrot.slane %v124_v56, 4  ;;  %v138_v62 = vsel %vm39_vm0, %v577_v26, 0.0  ;;  %v119_v14 = vadd.f32 %v118_v60, %v117_v55  ;;  %v132_v13 = vrot.slane %v131_v11, 4 }
  0x50   :  { %v370_v63 = vsel %vm196_vm7, %v340_v57, %v369_v54  ;;  %v107_v0 = vadd.f32 %v106_v58, %v105_v52  ;;  %v113_v6 = vrot.slane %v112_v10, 2  ;;  %v101_v21 = vrot.slane %v100_v61, 1 }
  0x51   :  { %v376_v8 = vsel %vm39_vm0, %v370_v63, 0.0  ;;  %v126_v12 = vadd.f32 %v125_v7, %v124_v56  ;;  %v120_v18 = vrot.slane %v119_v14, 2  ;;  %v139_v19 = vrot.slane %v138_v62, 4 }
  0x52   :  { %377 = vadd.xlane.f32.xlu1 %v376_v8  ;;  %v108_v16 = vrot.slane %v107_v0, 1  ;;  %v114_v17 = vadd.f32 %v113_v6, %v112_v10  ;;  %v102_v20 = vadd.f32 %v101_v21, %v100_v61  ;;  %v133_v23 = vadd.f32 %v132_v13, %v131_v11 }
  0x53   :  { %v127_v22 = vrot.slane %v126_v12, 2  ;;  %v145_v26 = vsel %vm39_vm0, %v581_v29, 0.0  ;;  %v121_v27 = vadd.f32 %v120_v18, %v119_v14  ;;  %v140_v28 = vadd.f32 %v139_v19, %v138_v62 }
  0x54   :  { %v109_v24 = vadd.f32 %v108_v16, %v107_v0  ;;  %v115_v25 = vrot.slane %v114_v17, 1  ;;  %v134_v15 = vrot.slane %v133_v23, 2  ;;  %v146_v30 = vrot.slane %v145_v26, 4 }
  0x55   :  { %v128_v9 = vadd.f32 %v127_v22, %v126_v12  ;;  %v160_v1 = vmul.f32 %v102_v20, %v102_v20  ;;  %v122_v32 = vrot.slane %v121_v27, 1  ;;  %v141_v33 = vrot.slane %v140_v28, 2 }
  0x56   :  { %v116_v31 = vadd.f32 %v115_v25, %v114_v17  ;;  %v161_v2 = vmul.f32 %v109_v24, %v109_v24  ;;  %v135_v35 = vadd.f32 %v134_v15, %v133_v23  ;;  %v147_v36 = vadd.f32 %v146_v30, %v145_v26 }
  0x57   :  { %v129_v34 = vrot.slane %v128_v9, 1  ;;  %v123_v37 = vadd.f32 %v122_v32, %v121_v27  ;;  %v142_v38 = vadd.f32 %v141_v33, %v140_v28  ;;  %v385_v57 = vlaneseq }
  0x58   :  { %v162_v39 = vmul.f32 %v116_v31, %v116_v31  ;;  %v198_v29 = vsel %vm184_vm1, %v161_v2, %v160_v1  ;;  %v136_v3 = vrot.slane %v135_v35, 1  ;;  %v148_v41 = vrot.slane %v147_v36, 2 }
  0x59   :  { %v130_v40 = vadd.f32 %v129_v34, %v128_v9  ;;  %v143_v42 = vrot.slane %v142_v38, 1  ;;  %v163_v43 = vmul.f32 %v123_v37, %v123_v37  ;;  %v386_v60 = vand.u32 127, %v385_v57 }
  0x5a   :  { %v199_v44 = vsel %vm186_vm2, %v162_v39, %v198_v29  ;;  %v137_v45 = vadd.f32 %v136_v3, %v135_v35  ;;  %v149_v4 = vadd.f32 %v148_v41, %v147_v36  ;;  %v388_v61 = vshrl.u32 %v385_v57, 7 }
  0x5b   :  { %v164_v46 = vmul.f32 %v130_v40, %v130_v40  ;;  %v144_v47 = vadd.f32 %v143_v42, %v142_v38  ;;  %v200_v48 = vsel %vm188_vm3, %v163_v43, %v199_v44  ;;  %v391_v11 = vadd.s32 4294967288, %v386_v60 }
  0x5c   :  { %v150_v51 = vrot.slane %v149_v4, 1  ;;  %v165_v49 = vmul.f32 %v137_v45, %v137_v45  ;;  %v389_v0 = vsub.s32 %v386_v60, %v388_v61  ;;  %vm396_vm8 = vcmask 130112  }
  0x5d   :  { %v201_v50 = vsel %vm190_vm4, %v164_v46, %v200_v48  ;;  %v166_v5 = vmul.f32 %v144_v47, %v144_v47  ;;  %v394_v14 = vsub.s32 %v391_v11, %v388_v61  ;;  %vm399_vm9 = vcmask 122880  }
  0x5e   :  { %v151_v52 = vadd.f32 %v150_v51, %v149_v4  ;;  %v202_v53 = vsel %vm192_vm5, %v165_v49, %v201_v50 }
  0x5f   :  { %v203_v54 = vsel %vm194_vm6, %v166_v5, %v202_v53 }
  0x60   :  { %v167_v59 = vmul.f32 %v151_v52, %v151_v52 }
  0x62   :  { %v204_v55 = vsel %vm196_vm7, %v167_v59, %v203_v54 }
  0x63   :  { %v210_v56 = vsel %vm39_vm0, %v204_v55, 0.0 }
  0x64   :  { %211 = vadd.xlane.f32.xlu0 %v210_v56 }
  0xba   :  { %v375_v58 = vpop.xlane.xlu1 %374 }
  0xcd   :  { %v209_v10 = vpop.xlane.xlu0 %208 }
  0xce   :  { %v379_v7 = vsub.f32 %v209_v10, %v375_v58 }
  0xd0   :  { %v381_v6 = vmul.f32 0.5, %v379_v7 }
  0xd2   :  { %v390_v12 = vrot.slane %v381_v6, %v389_v0 }
  0xdf   :  { %v378_v62 = vpop.xlane.xlu1 %377 }
  0xf1   :  { %v212_v63 = vpop.xlane.xlu0 %211 }
  0xf2   :  { %v380_v8 = vsub.f32 %v212_v63, %v378_v62 }
  0xf4   :  { %v382_v21 = vmul.f32 0.5, %v380_v8 }
  0xf6   :  { %v395_v13 = vrot.slane %v382_v21, %v394_v14 }
  0xf8   :  { %v397_v16 = vsel %vm396_vm8, %v395_v13, %v390_v12 }
  0xf9   :  { %400 = vst.msk [vmem:[#allocation5] sm:$0x1] %vm399_vm9, %v397_v16 }
  0xfa   :  { %453 = shalt.err (!%p450_p12)
}
  0xfb   :  { %s454_s25 = scalar_lea.hbm %s652_s1, 16 }
  0xfc   :  { %p455_p13 = scmp.ne.s32.totalorder %s652_s1, %s454_s25  ;;  %p458_p0 = scmp.lt.u32.totalorder %s454_s25, %s652_s1 }
  0xfe   :  { %p460_p1 = pnand %p458_p0, %p455_p13 }
 0x100   :  { %463 = shalt.err (!%p460_p1)
}
 0x101   :  { %410 = dma.vmem_to_hbm [thread:$0]  %s408_s20, 16, %s652_s1, [#allocation4]  }
 0x102   :  { %466 = dma.done.wait [#allocation4], 16  }
 0x103   :  { %467 = vsyncadd [#allocation4], 4294967280 }
 0x104   :  { %414 = vsyncpa [#allocation3], 1 }
 0x105   :  { %415 = vsyncpa [#allocation4], 1 }

</bundles_post_ra>
